<compile_context>
chip_gen: v7x
topology: tpu7x:2x2x1
jax: 0.10.0
libtpu: 0.0.40
codegen_flags: <defaults>
</compile_context>

<pallas_src>
import jax
import jax.numpy as jnp
from jax.experimental import pallas as pl
from jax.experimental.pallas import tpu as pltpu


def _round_up(a: int, b: int) -> int:
    return ((a + b - 1) // b) * b


def _dividing_tile(dim: int, unit: int, cap: int) -> int:
    """Largest multiple of `unit` that divides `dim` and is <= min(cap, dim).

    Precondition: dim % unit == 0 (so `unit` itself always works)."""
    start = (min(cap, dim) // unit) * unit
    for t in range(start, unit - 1, -unit):
        if dim % t == 0:
            return t
    return unit


def _domain_adapt_kernel(w_ref, x_ref, o_ref):
    # w_ref: (TS, 1)   x_ref / o_ref: (TS, THW)
    # Pure VPU multiply; (TS, 1) weight broadcasts over the lane axis.
    o_ref[...] = x_ref[...] * w_ref[...]


def domain_adaptation_layer(
    x,
    weights,
    *,
    ts_cap: int = 256,
    thw_cap: int = 2048,
    tile_budget_bytes: int = 2 * 1024 * 1024,
):
    """x: (N, C, H, W); weights: (C,) -> out = x * weights[None, :, None, None]."""
    N, C, H, W = x.shape
    HW, rows = H * W, N * C
    itemsize = jnp.dtype(x.dtype).itemsize

    # Lane-dense 2-D view: row index = n*C + c, per-row weight = weights[c].
    x2 = x.reshape(rows, HW)
    w2 = jnp.broadcast_to(weights.astype(x.dtype)[None, :], (N, C)).reshape(rows, 1)

    # ---------- lane (last) axis ----------
    if HW % 128 == 0:
        thw = _dividing_tile(HW, 128, thw_cap)          # divides HW -> no padding
        padded_hw = HW
    elif HW * itemsize * 8 <= tile_budget_bytes:
        thw = padded_hw = HW                            # small & unaligned: full extent
    else:
        padded_hw = _round_up(HW, 128)                  # large & unaligned: pad once
        thw = _dividing_tile(padded_hw, 128, thw_cap)

    # ---------- sublane (second-to-last) axis ----------
    row_bytes = thw * itemsize
    ts_budget = max(8, (tile_budget_bytes // row_bytes) // 8 * 8)
    cap = min(ts_cap, ts_budget)
    if rows % 8 == 0:
        ts = _dividing_tile(rows, 8, cap)               # divides rows -> no padding
        padded_rows = rows
    elif rows * row_bytes <= tile_budget_bytes:
        ts = padded_rows = rows                         # small & unaligned: full extent
    else:
        padded_rows = _round_up(rows, 8)                # large & unaligned: pad once
        ts = _dividing_tile(padded_rows, 8, cap)

    if padded_rows != rows or padded_hw != HW:
        x2 = jnp.pad(x2, ((0, padded_rows - rows), (0, padded_hw - HW)))
        w2 = jnp.pad(w2, ((0, padded_rows - rows), (0, 0)))

    grid = (padded_rows // ts, padded_hw // thw)

    out2 = pl.pallas_call(
        _domain_adapt_kernel,
        out_shape=jax.ShapeDtypeStruct((padded_rows, padded_hw), x.dtype),
        grid_spec=pltpu.PrefetchScalarGridSpec(
            num_scalar_prefetch=0,
            grid=grid,
            in_specs=[
                # Per-row weights: depend only on the row block; tiny DMA.
                pl.BlockSpec((ts, 1), lambda i, j: (i, 0)),
                # Activations: (TS, THW) streaming tiles.
                pl.BlockSpec((ts, thw), lambda i, j: (i, j)),
            ],
            out_specs=pl.BlockSpec((ts, thw), lambda i, j: (i, j)),
        ),
        compiler_params=pltpu.CompilerParams(
            dimension_semantics=("parallel", "parallel"),
        ),
    )(w2, x2)

    if padded_rows != rows or padded_hw != HW:
        out2 = out2[:rows, :HW]
    return out2.reshape(N, C, H, W)


if __name__ == "__main__":
    key = jax.random.PRNGKey(0)
    N, C, H, W = 2, 4, 16, 16

    kx, kw = jax.random.split(key)
    x = jax.random.normal(kx, (N, C, H, W), dtype=jnp.float32)
    # nn.Parameter(torch.ones(num_filters)) init, perturbed deterministically so
    # the per-channel scaling is non-trivial but reproducible.
    adaptation_weights = jnp.ones((C,), dtype=jnp.float32) + \
        0.1 * jax.random.normal(kw, (C,), dtype=jnp.float32)

    out = domain_adaptation_layer(x, adaptation_weights)
    out = jax.block_until_ready(out)

    # Reference check (plain JAX, mirrors the PyTorch broadcast exactly).
    ref = x * adaptation_weights.reshape(1, C, 1, 1)
    assert out.shape == (N, C, H, W)
    assert jnp.allclose(out, ref, atol=1e-6), "mismatch vs reference"

    print("KERNEL_OK")
</pallas_src>

<mosaic_0001>
module attributes {stable_mosaic.version = 11 : i64} {
  func.func @_domain_adapt_kernel(%arg0: i32, %arg1: i32, %arg2: memref<8x1xf32, #tpu.memory_space<vmem>>, %arg3: memref<8x256xf32, #tpu.memory_space<vmem>>, %arg4: memref<8x256xf32, #tpu.memory_space<vmem>>) attributes {dimension_semantics = [#tpu.dimension_semantics<parallel>, #tpu.dimension_semantics<parallel>], iteration_bounds = array<i64: 1, 1>, scalar_prefetch = 0 : i64, scratch_operands = 0 : i64, tpu.core_type = #tpu.core_type<tc>, window_params = [{transform_indices = @transform_0, window_bounds = array<i64: 8, 1>}, {transform_indices = @transform_1, window_bounds = array<i64: 8, 256>}, {transform_indices = @transform_2, window_bounds = array<i64: 8, 256>}]} {
    %c0 = arith.constant 0 : index
    %c0_0 = arith.constant 0 : index
    %0 = vector.load %arg3[%c0, %c0_0] : memref<8x256xf32, #tpu.memory_space<vmem>>, vector<8x256xf32>
    %c0_1 = arith.constant 0 : index
    %c0_2 = arith.constant 0 : index
    %1 = vector.load %arg2[%c0_1, %c0_2] : memref<8x1xf32, #tpu.memory_space<vmem>>, vector<8x1xf32>
    %2 = vector.broadcast %1 : vector<8x1xf32> to vector<8x256xf32>
    %3 = arith.mulf %0, %2 : vector<8x256xf32>
    %c0_3 = arith.constant 0 : index
    %c0_4 = arith.constant 0 : index
    %4 = vector.load %arg4[%c0_3, %c0_4] : memref<8x256xf32, #tpu.memory_space<vmem>>, vector<8x256xf32>
    tpu.vector_store %arg4[%c0_3, %c0_4], %3 {strides = array<i32>} : memref<8x256xf32, #tpu.memory_space<vmem>>, vector<8x256xf32>,
    return
  }
  func.func @transform_0(%arg0: i32, %arg1: i32) -> (i32, i32) {
    %c0_i32 = arith.constant 0 : i32
    %c0_i32_0 = arith.constant 0 : i32
    return %arg0, %c0_i32 : i32, i32
  }
  func.func @transform_1(%arg0: i32, %arg1: i32) -> (i32, i32) {
    %c0_i32 = arith.constant 0 : i32
    return %arg0, %arg1 : i32, i32
  }
  func.func @transform_2(%arg0: i32, %arg1: i32) -> (i32, i32) {
    %c0_i32 = arith.constant 0 : i32
    return %arg0, %arg1 : i32, i32
  }
}

</mosaic_0001>

<bundles_post_ra>
// kernel: tpu_custom_call.1
= control target key start
LH: loop header
LB: loop body
LE: loop exit
PB: predicated region body
PF: predicated region fallthrough
CT: control target
= control target key end

     0   :  { %7 = vsyncpa [#allocation3], 0  ;;  %s148_s0 = inlined_call_operand.vmem [shape: f32[8,1], index: 0, kind: input, shape index: {}]   ;;  %s149_s1 = inlined_call_operand.hbm [shape: f32[8,256], index: 1, kind: input, shape index: {}]   ;;  %s150_s2 = inlined_call_operand.hbm [shape: f32[8,256], index: 2, kind: output, shape index: {}]  }
   0x1   :  { %8 = vsyncpa [#allocation4], 0  ;;  %s103_s9 = smov [#allocation2]   ;;  %s55_s13 = scalar_lea.hbm %s149_s1, 256 }
   0x2   :  { %s17_s10 = sshll.u32 %s103_s9, 4  ;;  %p56_p0 = scmp.ne.s32.totalorder %s149_s1, %s55_s13  ;;  %s18_s10 = int_to_ptr.vmem [resolvable:$true] %s17_s10 }
   0x3   :  { %p59_p1 = scmp.lt.u32.totalorder %s55_s13, %s149_s1 }
   0x5   :  { %p61_p2 = pnand %p59_p1, %p56_p0 }
   0x7   :  { %64 = shalt.err (!%p61_p2)
}
   0x8   :  { %s65_s18 = scalar_lea.vmem %s18_s10, 256  ;;  %p70_p4 = scmp.lt.s32.totalorder %s18_s10, %s18_s10 }
   0x9   :  { %p66_p3 = scmp.ne.s32.totalorder %s18_s10, %s65_s18  ;;  %p71_p5 = scmp.lt.s32.totalorder %s65_s18, %s65_s18 }
   0xb   :  { %p72_p6 = por %p71_p5, %p70_p4 }
   0xd   :  { %p73_p7 = pnand %p72_p6, %p66_p3 }
   0xf   :  { %76 = shalt.err (!%p73_p7)
}
  0x10   :  { %20 = dma.hbm_to_vmem [thread:$0]  %s149_s1, 256, %s18_s10, [#allocation3]  }
  0x11   :  { %99 = dma.done.wait [#allocation3], 256  }
  0x12   :  { %100 = vsyncadd [#allocation3], 4294967040  ;;  %v104_v0 = vmov 0   ;;  %v26_v1 = vld [vmem:[%s148_s0] sm:$0xff]  ;;  %v25_v3 = vld [vmem:[#allocation2 + $0x8] sm:$0xff]  ;;  %s105_s23 = smov [#allocation5]  }
  0x13   :  { %54 = vset.pattern.permute.xlu0 %v104_v0  ;;  %v24_v2 = vld [vmem:[#allocation2] sm:$0xff]  ;;  %s42_s24 = sshll.u32 %s105_s23, 4  ;;  %s43_s24 = int_to_ptr.vmem [resolvable:$true] %s42_s24 }
  0x14   :  { %29 = vperm.xlu0 %54, %v26_v1   ;;  %s77_s1 = scalar_lea.vmem %s43_s24, 256  ;;  %p82_p9 = scmp.lt.s32.totalorder %s43_s24, %s43_s24 }
  0x15   :  { %p78_p8 = scmp.ne.s32.totalorder %s43_s24, %s77_s1  ;;  %p83_p10 = scmp.lt.s32.totalorder %s77_s1, %s77_s1 }
  0x17   :  { %p84_p11 = por %p83_p10, %p82_p9 }
  0x19   :  { %p85_p12 = pnand %p84_p11, %p78_p8 }
  0x93   :  { %v30_v4 = vpop.permute.xlu0 %29 }
  0x94   :  { %v32_v5 = vmul.f32 %v30_v4, %v24_v2  ;;  %v33_v6 = vmul.f32 %v30_v4, %v25_v3 }
  0x96   :  { %34 = vst [vmem:[#allocation5] sm:$0xff] %v32_v5  ;;  %35 = vst [vmem:[#allocation5 + $0x8] sm:$0xff] %v33_v6 }
  0x97   :  { %88 = shalt.err (!%p85_p12)
}
  0x98   :  { %s89_s26 = scalar_lea.hbm %s150_s2, 256 }
  0x99   :  { %p90_p13 = scmp.ne.s32.totalorder %s150_s2, %s89_s26  ;;  %p93_p0 = scmp.lt.u32.totalorder %s89_s26, %s150_s2 }
  0x9b   :  { %p95_p1 = pnand %p93_p0, %p90_p13 }
  0x9d   :  { %98 = shalt.err (!%p95_p1)
}
  0x9e   :  { %45 = dma.vmem_to_hbm [thread:$0]  %s43_s24, 256, %s150_s2, [#allocation4]  }
  0x9f   :  { %101 = dma.done.wait [#allocation4], 256  }
  0xa0   :  { %102 = vsyncadd [#allocation4], 4294967040 }
  0xa1   :  { %49 = vsyncpa [#allocation3], 1 }
  0xa2   :  { %50 = vsyncpa [#allocation4], 1 }

</bundles_post_ra>
